<compile_context>
chip_gen: v6e
topology: v6e:2x2x1
jax: 0.10.0
libtpu: 0.0.40
codegen_flags: <defaults>
</compile_context>

<pallas_src>
import numpy as np
import jax
import jax.numpy as jnp
from jax.experimental import pallas as pl
from jax.experimental.pallas import tpu as pltpu


def _round_up(x: int, m: int) -> int:
    return ((x + m - 1) // m) * m


def _clip_kernel(x_ref, lo_ref, hi_ref, o_ref):
    # lo/hi are (1, L) constant rows; broadcast across sublanes.
    o_ref[...] = jnp.minimum(jnp.maximum(x_ref[...], lo_ref[...]), hi_ref[...])


def _clip_boxes_jnp(boxes, height, width):
    """Fused-XLA reference / small-problem fallback (same dtype semantics)."""
    dt = boxes.dtype
    x1 = jnp.maximum(boxes[:, :, 0], jnp.asarray(0, dt))
    y1 = jnp.maximum(boxes[:, :, 1], jnp.asarray(0, dt))
    x2 = jnp.minimum(boxes[:, :, 2], jnp.asarray(width - 1, dt))
    y2 = jnp.minimum(boxes[:, :, 3], jnp.asarray(height - 1, dt))
    return jnp.stack([x1, y1, x2, y2], axis=-1)


def _make_bounds(dtype, lane_tile, height, width):
    """Per-lane clamp bounds: coordinate index == lane % 4 (lane_tile % 4 == 0)."""
    if jnp.issubdtype(dtype, jnp.floating):
        lo_pat = np.array([0.0, 0.0, -np.inf, -np.inf], dtype=np.float64)
        hi_pat = np.array([np.inf, np.inf, width - 1, height - 1], dtype=np.float64)
    else:
        info = jnp.iinfo(dtype)
        lo_pat = np.array([0, 0, info.min, info.min], dtype=np.int64)
        hi_pat = np.array([info.max, info.max, width - 1, height - 1], dtype=np.int64)
    lo = jnp.asarray(np.tile(lo_pat, lane_tile // 4).reshape(1, lane_tile), dtype=dtype)
    hi = jnp.asarray(np.tile(hi_pat, lane_tile // 4).reshape(1, lane_tile), dtype=dtype)
    return lo, hi


def _choose_tiling(total, dtype, max_lane_tile, max_row_tile):
    """Pick (lane_tile L, row_tile R, rows). Prefer an exact factorization so the
    wrapper avoids jnp.pad / slice copies; fall back to a padded layout."""
    itemsize = jnp.dtype(dtype).itemsize
    sub = max(8, 32 // itemsize)  # sublane multiple incl. sub-32-bit packing
    assert max_lane_tile % 128 == 0 and max_lane_tile % 4 == 0
    assert max_row_tile % sub == 0

    # --- No-pad fast path -------------------------------------------------
    lane_cands = sorted({c for c in (max_lane_tile, 512, 256, 128)
                         if c <= max_lane_tile and c % 128 == 0}, reverse=True)
    for L in lane_cands:
        if total % L:
            continue
        rows = total // L
        if rows % sub:
            continue
        R = min(max_row_tile, rows)
        R -= R % sub
        while R >= sub and rows % R:
            R -= sub
        # Only take it if blocks stay big enough to amortize per-step overhead.
        if R >= sub and R >= min(rows, 128, max_row_tile):
            return L, R, rows
    # --- Padded fallback ----------------------------------------------------
    L = max_lane_tile
    rows_needed = int(pl.cdiv(total, L))
    R = min(max_row_tile, _round_up(rows_needed, sub))
    rows = _round_up(rows_needed, R)
    return L, R, rows


def clip_boxes(boxes: jax.Array, img: jax.Array, *,
               use_pallas: bool | None = None,
               lane_tile: int = 512,
               max_row_tile: int = 512) -> jax.Array:
    """Pallas equivalent of ClipBoxes.forward(boxes, img) (functional)."""
    B, N, C = boxes.shape
    batch_size, _num_channels, height, width = img.shape
    assert C == 4 and B == batch_size
    height, width = int(height), int(width)
    dtype = boxes.dtype
    itemsize = jnp.dtype(dtype).itemsize
    total = B * N * 4

    if use_pallas is None:
        # Below ~64K elements launch/grid-step overhead dominates; XLA's fused
        # elementwise clamp is already optimal there.
        use_pallas = total >= (1 << 16)
    if not use_pallas:
        return _clip_boxes_jnp(boxes, height, width)

    L, R, rows = _choose_tiling(total, dtype, lane_tile, max_row_tile)
    padded_total = rows * L

    lo, hi = _make_bounds(dtype, L, height, width)

    flat = boxes.reshape(total)
    if padded_total != total:
        flat = jnp.pad(flat, (0, padded_total - total))  # padded elems clamped then sliced off
    x2d = flat.reshape(rows, L)

    out2d = pl.pallas_call(
        _clip_kernel,
        out_shape=jax.ShapeDtypeStruct((rows, L), dtype),
        grid_spec=pltpu.PrefetchScalarGridSpec(
            num_scalar_prefetch=0,
            grid=(rows // R,),
            in_specs=[
                pl.BlockSpec((R, L), lambda i: (i, 0)),
                pl.BlockSpec((1, L), lambda i: (0, 0)),
                pl.BlockSpec((1, L), lambda i: (0, 0)),
            ],
            out_specs=pl.BlockSpec((R, L), lambda i: (i, 0)),
        ),
        compiler_params=pltpu.CompilerParams(
            dimension_semantics=("parallel",),
        ),
        input_output_aliases={0: 0},  # clip in place; no extra HBM output alloc
        cost_estimate=pl.CostEstimate(
            flops=2 * padded_total,
            transcendentals=0,
            bytes_accessed=2 * padded_total * itemsize,
        ),
    )(x2d, lo, hi)

    out_flat = out2d.reshape(padded_total)
    if padded_total != total:
        out_flat = out_flat[:total]
    return out_flat.reshape(B, N, 4)
    # TODO(synk): PyTorch mutates `boxes` in place via view assignment; here we
    # return a new (possibly aliased) array — values are identical.


if __name__ == "__main__":
    key = jax.random.PRNGKey(0)
    k_boxes, k_img = jax.random.split(key)

    B, C, H, W = 2, 4, 16, 16
    N = 8  # number of boxes per image

    # Boxes spanning both in-range and out-of-range values to exercise the clamps.
    boxes = jax.random.uniform(
        k_boxes, (B, N, 4), dtype=jnp.float32, minval=-10.0, maxval=25.0
    )
    img = jax.random.normal(k_img, (B, C, H, W), dtype=jnp.float32)

    # Compute the reference BEFORE the kernel call (the kernel may alias its
    # input buffer), then force the Pallas path at this tiny size.
    ref = _clip_boxes_jnp(boxes, H, W)
    out = jax.block_until_ready(clip_boxes(boxes, img, use_pallas=True))
    assert out.shape == boxes.shape and out.dtype == boxes.dtype
    assert bool(jnp.all(out == ref))

    # Larger lane-aligned shape: exercises the no-pad fast path (no pad/slice).
    N2 = 4096
    boxes2 = jax.random.uniform(
        jax.random.PRNGKey(1), (B, N2, 4), dtype=jnp.float32, minval=-50.0, maxval=80.0
    )
    ref2 = _clip_boxes_jnp(boxes2, H, W)
    out2 = jax.block_until_ready(clip_boxes(boxes2, img, use_pallas=True))
    assert bool(jnp.all(out2 == ref2))

    # bf16 path (dtype-generic bounds + sub-32-bit sublane packing).
    boxes_bf16 = boxes.astype(jnp.bfloat16)
    ref_bf16 = _clip_boxes_jnp(boxes_bf16, H, W)
    out_bf16 = jax.block_until_ready(clip_boxes(boxes_bf16, img, use_pallas=True))
    assert out_bf16.dtype == jnp.bfloat16
    assert bool(jnp.all(out_bf16 == ref_bf16))

    print("KERNEL_OK")
</pallas_src>

<mosaic_0001>
module attributes {stable_mosaic.version = 11 : i64} {
  func.func @_clip_kernel(%arg0: i32, %arg1: memref<8x512xf32, #tpu.memory_space<vmem>>, %arg2: memref<1x512xf32, #tpu.memory_space<vmem>>, %arg3: memref<1x512xf32, #tpu.memory_space<vmem>>, %arg4: memref<8x512xf32, #tpu.memory_space<vmem>>) attributes {dimension_semantics = [#tpu.dimension_semantics<parallel>], iteration_bounds = array<i64: 1>, scalar_prefetch = 0 : i64, scratch_operands = 0 : i64, tpu.core_type = #tpu.core_type<tc>, window_params = [{transform_indices = @transform_0, window_bounds = array<i64: 8, 512>}, {pipeline_mode = #tpu.pipeline_mode<synchronous>, transform_indices = @transform_1, window_bounds = array<i64: 1, 512>}, {pipeline_mode = #tpu.pipeline_mode<synchronous>, transform_indices = @transform_2, window_bounds = array<i64: 1, 512>}, {transform_indices = @transform_3, window_bounds = array<i64: 8, 512>}]} {
    %c0 = arith.constant 0 : index
    %c0_0 = arith.constant 0 : index
    %0 = vector.load %arg1[%c0, %c0_0] : memref<8x512xf32, #tpu.memory_space<vmem>>, vector<8x512xf32>
    %c0_1 = arith.constant 0 : index
    %c0_2 = arith.constant 0 : index
    %1 = vector.load %arg2[%c0_1, %c0_2] : memref<1x512xf32, #tpu.memory_space<vmem>>, vector<1x512xf32>
    %2 = vector.broadcast %1 : vector<1x512xf32> to vector<8x512xf32>
    %3 = arith.maximumf %0, %2 : vector<8x512xf32>
    %c0_3 = arith.constant 0 : index
    %c0_4 = arith.constant 0 : index
    %4 = vector.load %arg3[%c0_3, %c0_4] : memref<1x512xf32, #tpu.memory_space<vmem>>, vector<1x512xf32>
    %5 = vector.broadcast %4 : vector<1x512xf32> to vector<8x512xf32>
    %6 = arith.minimumf %3, %5 : vector<8x512xf32>
    %c0_5 = arith.constant 0 : index
    %c0_6 = arith.constant 0 : index
    %7 = vector.load %arg4[%c0_5, %c0_6] : memref<8x512xf32, #tpu.memory_space<vmem>>, vector<8x512xf32>
    tpu.vector_store %arg4[%c0_5, %c0_6], %6 {strides = array<i32>} : memref<8x512xf32, #tpu.memory_space<vmem>>, vector<8x512xf32>,
    return
  }
  func.func @transform_0(%arg0: i32) -> (i32, i32) {
    %c0_i32 = arith.constant 0 : i32
    %c0_i32_0 = arith.constant 0 : i32
    return %arg0, %c0_i32 : i32, i32
  }
  func.func @transform_1(%arg0: i32) -> (i32, i32) {
    %c0_i32 = arith.constant 0 : i32
    %c0_i32_0 = arith.constant 0 : i32
    %c0_i32_1 = arith.constant 0 : i32
    return %c0_i32, %c0_i32_0 : i32, i32
  }
  func.func @transform_2(%arg0: i32) -> (i32, i32) {
    %c0_i32 = arith.constant 0 : i32
    %c0_i32_0 = arith.constant 0 : i32
    %c0_i32_1 = arith.constant 0 : i32
    return %c0_i32, %c0_i32_0 : i32, i32
  }
  func.func @transform_3(%arg0: i32) -> (i32, i32) {
    %c0_i32 = arith.constant 0 : i32
    %c0_i32_0 = arith.constant 0 : i32
    return %arg0, %c0_i32 : i32, i32
  }
}

</mosaic_0001>

<bundles_post_ra>
// kernel: tpu_custom_call.1
= control target key start
LH: loop header
LB: loop body
LE: loop exit
PB: predicated region body
PF: predicated region fallthrough
CT: control target
= control target key end

     0   :  { %8 = vsyncpa [#allocation3], 0  ;;  %s182_s0 = inlined_call_operand.hbm [shape: f32[8,512], index: 0, kind: input, shape index: {}, may-alias: {0,3}]   ;;  %s183_s1 = inlined_call_operand.vmem [shape: f32[1,512], index: 1, kind: input, shape index: {}]   ;;  %s184_s2 = inlined_call_operand.vmem [shape: f32[1,512], index: 2, kind: input, shape index: {}]   ;;  %s185_s3 = inlined_call_operand.hbm [shape: f32[8,512], index: 3, kind: output, shape index: {}, may-alias: {0,3}]  }
   0x1   :  { %9 = vsyncpa [#allocation4], 0  ;;  %s148_s12 = smov [#allocation2]  }
   0x2   :  { %s16_s13 = sshll.u32 %s148_s12, 4  ;;  %s17_s13 = int_to_ptr.vmem [resolvable:$true] %s16_s13 }
   0x3   :  { %s112_s14 = scalar_lea.vmem %s17_s13, 512  ;;  %p117_p1 = scmp.lt.s32.totalorder %s17_s13, %s17_s13 }
   0x4   :  { %p113_p0 = scmp.ne.s32.totalorder %s17_s13, %s112_s14  ;;  %p118_p2 = scmp.lt.s32.totalorder %s112_s14, %s112_s14 }
   0x6   :  { %p119_p3 = por %p118_p2, %p117_p1 }
   0x8   :  { %p120_p4 = pnand %p119_p3, %p113_p0 }
   0xa   :  { %123 = shalt.err (!%p120_p4)
}
   0xb   :  { %19 = dma.hbm_to_vmem [thread:$0]  %s182_s0, 512, %s17_s13, [#allocation3]  }
   0xc   :  { %144 = dma.done.wait [#allocation3], 512  }
   0xd   :  { %145 = vsyncadd [#allocation3], 4294966784  ;;  %v33_v0 = vlaneseq  ;;  %v27_v6 = vld [vmem:[#allocation2] sm:$0xff]  ;;  %v28_v11 = vld [vmem:[#allocation2 + $0x8] sm:$0xff]  ;;  %s149_s0 = smov [#allocation5]  }
   0xe   :  { %v31_v7 = vld [vmem:[%s183_s1] sm:$0xf]  ;;  %v29_v14 = vld [vmem:[#allocation2 + $0x10] sm:$0xff]  ;;  %v30_v15 = vld [vmem:[#allocation2 + $0x18] sm:$0xff]  ;;  %s93_s21 = sshll.u32 %s149_s0, 4  ;;  %s94_s21 = int_to_ptr.vmem [resolvable:$true] %s93_s21 }
   0xf   :  { %v34_v1 = vshrl.u32 %v33_v0, 7  ;;  %v57_v8 = vld [vmem:[%s184_s2] sm:$0xf]  ;;  %s124_s1 = scalar_lea.vmem %s94_s21, 512  ;;  %p129_p6 = scmp.lt.s32.totalorder %s94_s21, %s94_s21 }
  0x10   :  { %p125_p5 = scmp.ne.s32.totalorder %s94_s21, %s124_s1  ;;  %p130_p7 = scmp.lt.s32.totalorder %s124_s1, %s124_s1 }
  0x11   :  { %v35_v2 = vsub.s32 0, %v34_v1  ;;  %v39_v3 = vsub.s32 1, %v34_v1  ;;  %v43_v4 = vsub.s32 2, %v34_v1  ;;  %v47_v5 = vsub.s32 3, %v34_v1 }
  0x12   :  { %p131_p8 = por %p130_p7, %p129_p6 }
  0x13   :  { %v36_v9 = vrot.slane %v31_v7, %v35_v2  ;;  %v62_v10 = vrot.slane %v57_v8, %v35_v2  ;;  %v40_v12 = vrot.slane %v31_v7, %v39_v3  ;;  %v66_v13 = vrot.slane %v57_v8, %v39_v3 }
  0x14   :  { %v44_v16 = vrot.slane %v31_v7, %v43_v4  ;;  %v70_v17 = vrot.slane %v57_v8, %v43_v4  ;;  %v48_v18 = vrot.slane %v31_v7, %v47_v5  ;;  %v74_v19 = vrot.slane %v57_v8, %v47_v5  ;;  %p132_p9 = pnand %p131_p8, %p125_p5 }
  0x15   :  { %v53_v20 = vmax.f32 %v27_v6, %v36_v9  ;;  %v54_v21 = vmax.f32 %v28_v11, %v40_v12 }
  0x16   :  { %v55_v22 = vmax.f32 %v29_v14, %v44_v16  ;;  %v56_v23 = vmax.f32 %v30_v15, %v48_v18 }
  0x17   :  { %v79_v24 = vmin.f32 %v53_v20, %v62_v10  ;;  %v80_v25 = vmin.f32 %v54_v21, %v66_v13 }
  0x18   :  { %v81_v26 = vmin.f32 %v55_v22, %v70_v17  ;;  %v82_v27 = vmin.f32 %v56_v23, %v74_v19 }
  0x19   :  { %83 = vst [vmem:[#allocation5] sm:$0xff] %v79_v24  ;;  %84 = vst [vmem:[#allocation5 + $0x8] sm:$0xff] %v80_v25 }
  0x1a   :  { %85 = vst [vmem:[#allocation5 + $0x10] sm:$0xff] %v81_v26  ;;  %86 = vst [vmem:[#allocation5 + $0x18] sm:$0xff] %v82_v27 }
  0x1b   :  { %135 = shalt.err (!%p132_p9)
}
  0x1c   :  { %96 = dma.vmem_to_hbm [thread:$0]  %s94_s21, 512, %s185_s3, [#allocation4]  }
  0x1d   :  { %146 = dma.done.wait [#allocation4], 512  }
  0x1e   :  { %147 = vsyncadd [#allocation4], 4294966784 }
  0x1f   :  { %100 = vsyncpa [#allocation3], 1 }
  0x20   :  { %101 = vsyncpa [#allocation4], 1 }

</bundles_post_ra>
